<compile_context>
chip_gen: v7x
topology: tpu7x:2x2x1
jax: 0.10.0
libtpu: 0.0.40
codegen_flags: <defaults>
</compile_context>

<pallas_src>
import functools
import math

import jax
import jax.numpy as jnp
from jax.experimental import pallas as pl
from jax.experimental.pallas import tpu as pltpu


def _cb_focal_kernel(gamma, eps, chunk, x_ref, t_ref, o_ref):
    """One batch tile: fused logits->BCE->focal + partial sum (no weights — applied in wrapper).

    Per grid step:
      x_ref, t_ref : (TB8, 8, W)  packed logits / targets (bf16 or f32)
      o_ref        : (1, 8, W)    per-tile partial sums (reduced over TB8 only -> VPU adds)
    The TB8 axis is walked by a fori_loop in chunks of `chunk` sub-rows so that only a
    handful of (chunk, 8, W) intermediates are ever live (stays in vregs, no VMEM churn).
    """
    lo = math.log(eps)
    hi = math.log1p(-eps)
    n_chunks = x_ref.shape[0] // chunk

    def body(i, acc):
        s = pl.multiple_of(i * chunk, chunk)
        x = x_ref[pl.ds(s, chunk)].astype(jnp.float32)
        t = t_ref[pl.ds(s, chunk)].astype(jnp.float32)

        # --- BCE straight from logits (EUP: one exp + one log) ----------------------
        e = jnp.exp(-jnp.abs(x))                       # exp(-|x|)
        log_y = jnp.minimum(x, 0.0) - jnp.log(1.0 + e)  # log(sigmoid(x))
        log_1my = log_y - x                             # log(1 - sigmoid(x))
        # reproduce torch.clamp(y, eps, 1 - eps) applied before the logs
        log_y = jnp.clip(log_y, lo, hi)
        log_1my = jnp.clip(log_1my, lo, hi)
        # bce = -(t*log_y + (1-t)*log_1my), re-formed to save VPU ops
        bce = -(log_1my + t * (log_y - log_1my))

        # --- sigmoid reconstructed from e: approx EUP reciprocal + 1 Newton step ----
        d = 1.0 + e
        r = pl.reciprocal(d, approx=True)
        r = r * (2.0 - d * r)                          # Newton refine (rel err ~1e-7)
        y = jnp.where(x >= 0.0, 1.0, e) * r            # sigmoid(x)

        # --- focal modulating factor: base = 1 - p_t = y + t - 2*t*y -----------------
        base = y + t - 2.0 * (t * y)
        if gamma == 2.0:                               # default: VPU square, no EUP pow
            mod = base * base
        elif gamma == 1.0:
            mod = base
        elif float(gamma).is_integer() and 1.0 <= gamma <= 8.0:
            mod = base
            for _ in range(int(gamma) - 1):
                mod = mod * base
        else:
            mod = jnp.power(base, gamma)               # generic fallback

        # alpha = -1  =>  alpha_factor == 1; class weights applied in the wrapper.
        return acc + jnp.sum(mod * bce, axis=0)        # (8, W), pure VPU adds

    acc0 = jnp.zeros(o_ref.shape[1:], jnp.float32)
    o_ref[0] = jax.lax.fori_loop(0, n_chunks, body, acc0)


def class_balanced_loss(logits, target, class_weights, *, beta, gamma=2.0, eps=1e-8):
    """JAX/Pallas equivalent of ClassBalancedLoss(class_weights, beta, gamma)(logits, target)."""
    B, C = logits.shape
    assert target.shape == (B, C)
    assert class_weights.shape == (C,)

    # ---- class-balance re-weighting (tiny length-C glue, plain JAX) ----
    cw = class_weights.astype(jnp.float32)
    effective_num = 1.0 - jnp.power(jnp.float32(beta), cw)
    weights = (1.0 - beta) / effective_num
    weights = weights / jnp.sum(weights) * C                        # (C,)

    # ---- lane packing: pad C to a divisor of 128, fold P batch rows per 128-lane row ----
    if C <= 128:
        C_pad = 1 << (C - 1).bit_length()        # next power of two -> divides 128
        P = 128 // C_pad
    else:
        C_pad = ((C + 127) // 128) * 128
        P = 1
    W = P * C_pad                                 # always a multiple of 128 (lane-dense)
    weights_p = jnp.pad(weights, (0, C_pad - C)) if C_pad != C else weights
    w_full = jnp.tile(weights_p, P)               # (W,)  — padded classes get weight 0

    # ---- tile size along packed rows: ~2 MiB/input block, >=2 tiles when possible ----
    CH = 8                                        # sub-rows (of 8 packed rows) per loop chunk
    GRAN = 8 * CH                                 # TB granularity in packed rows
    itemsize = max(jnp.dtype(logits.dtype).itemsize, jnp.dtype(target.dtype).itemsize)
    target_block_bytes = 2 << 20
    TB_target = (target_block_bytes // (W * itemsize)) // GRAN * GRAN
    TB_target = max(GRAN, min(8192, TB_target))

    R = -(-B // P)                                # packed rows needed
    G = max(1, -(-R // TB_target))
    if G == 1 and R > GRAN:
        G = 2                                     # let v7x megacore shard the parallel axis
    rows_per_tile = -(-R // G)
    TB = max(GRAN, -(-rows_per_tile // GRAN) * GRAN)
    R_pad = G * TB
    B_pad = R_pad * P

    # Pad extra batch rows with (logit=-40, target=0): per-element contribution ~1e-43
    # (flushed/denormal), far below f32 resolution of the result, so padding is effectively
    # masked without streaming a mask.  Padded class columns get weight 0 in the wrapper.
    pad_b = B_pad - B
    pad_c = C_pad - C
    if pad_b or pad_c:
        logits = jnp.pad(logits, ((0, pad_b), (0, pad_c)), constant_values=-40.0)
        target = jnp.pad(target, ((0, pad_b), (0, pad_c)), constant_values=0.0)

    # (B_pad, C_pad) -> (R_pad//8, 8, W): contiguous row-major reshape, lane-dense rows.
    x3 = logits.reshape(R_pad // 8, 8, W)
    t3 = target.reshape(R_pad // 8, 8, W)
    TB8 = TB // 8

    n_elem = R_pad * 8 * W
    cost = pl.CostEstimate(
        flops=27 * n_elem,
        transcendentals=3 * n_elem,
        bytes_accessed=int(x3.size * jnp.dtype(logits.dtype).itemsize
                           + t3.size * jnp.dtype(target.dtype).itemsize
                           + G * 8 * W * 4),
    )

    kernel = functools.partial(_cb_focal_kernel, float(gamma), float(eps), CH)
    partials = pl.pallas_call(
        kernel,
        out_shape=jax.ShapeDtypeStruct((G, 8, W), jnp.float32),
        grid_spec=pltpu.PrefetchScalarGridSpec(
            num_scalar_prefetch=0,
            grid=(G,),
            in_specs=[
                pl.BlockSpec((TB8, 8, W), lambda i: (i, 0, 0)),   # logits tile
                pl.BlockSpec((TB8, 8, W), lambda i: (i, 0, 0)),   # target tile
            ],
            out_specs=pl.BlockSpec((1, 8, W), lambda i: (i, 0, 0)),
        ),
        compiler_params=pltpu.CompilerParams(
            dimension_semantics=("parallel",),        # independent tiles -> megacore-shardable
            vmem_limit_bytes=32 * 1024 * 1024,        # headroom for 2x2x2 MiB double buffers
        ),
        cost_estimate=cost,
    )(x3, t3)

    # Class-balance weights commute with the batch sum -> apply once on the tiny partials.
    # reduction='none' branch of forward(): mean over batch of per-sample class sums.
    return jnp.sum(partials * w_full) / jnp.float32(B)


def _reference(logits, target, class_weights, *, beta, gamma=2.0, eps=1e-8):
    """Pure-JAX transcription of the PyTorch module (for a sanity check)."""
    C = logits.shape[1]
    cw = class_weights.astype(jnp.float32)
    effective_num = 1.0 - jnp.power(jnp.float32(beta), cw)
    w = (1.0 - beta) / effective_num
    w = w / jnp.sum(w) * C
    y = jax.nn.sigmoid(logits.astype(jnp.float32))
    y = jnp.clip(y, eps, 1.0 - eps)
    t = target.astype(jnp.float32)
    bce = -(t * jnp.log(y) + (1.0 - t) * jnp.log(1.0 - y))
    p_t = t * y + (1.0 - t) * (1.0 - y)
    loss = jnp.power(1.0 - p_t, gamma) * bce
    loss = w[None, :] * loss
    return jnp.mean(jnp.sum(loss, axis=-1))


if __name__ == "__main__":
    key = jax.random.PRNGKey(0)
    k1, k2 = jax.random.split(key, 2)

    # Small shapes consistent with the module: per-sample multi-label logits (B, C).
    B, C = 8, 16
    logits = jax.random.normal(k1, (B, C), dtype=jnp.float32)
    target = (jax.random.uniform(k2, (B, C)) > 0.5).astype(jnp.float32)

    # Deterministic synthetic "samples per class" (the module's class_weights arg).
    samples_per_class = jnp.arange(1, C + 1, dtype=jnp.float32) * 10.0
    beta = 0.999
    gamma = 2.0

    out = class_balanced_loss(logits, target, samples_per_class, beta=beta, gamma=gamma)
    out = jax.block_until_ready(out)

    ref = jax.block_until_ready(
        _reference(logits, target, samples_per_class, beta=beta, gamma=gamma))
    assert abs(float(out) - float(ref)) <= 1e-4 * (abs(float(ref)) + 1e-6), (out, ref)

    print("KERNEL_OK")
</pallas_src>

<mosaic_0001>
module attributes {stable_mosaic.version = 11 : i64} {
  func.func @_cb_focal_kernel(%arg0: i32, %arg1: memref<8x8x128xf32, #tpu.memory_space<vmem>>, %arg2: memref<8x8x128xf32, #tpu.memory_space<vmem>>, %arg3: memref<1x8x128xf32, #tpu.memory_space<vmem>>) attributes {dimension_semantics = [#tpu.dimension_semantics<parallel>], iteration_bounds = array<i64: 1>, scalar_prefetch = 0 : i64, scratch_operands = 0 : i64, tpu.core_type = #tpu.core_type<tc>, window_params = [{transform_indices = @transform_0, window_bounds = array<i64: 8, 8, 128>}, {transform_indices = @transform_1, window_bounds = array<i64: 8, 8, 128>}, {transform_indices = @transform_2, window_bounds = array<i64: 1, 8, 128>}]} {
    %cst = arith.constant 0.000000e+00 : f32
    %0 = vector.broadcast %cst : f32 to vector<8x128xf32>
    %c0_i32 = arith.constant 0 : i32
    %c8_i32 = arith.constant 8 : i32
    %1 = arith.muli %c0_i32, %c8_i32 : i32
    %2 = tpu.assume_multiple %1, 8 : i32
    %3 = arith.index_cast %2 : i32 to index
    %c0 = arith.constant 0 : index
    %c0_0 = arith.constant 0 : index
    %4 = vector.load %arg1[%3, %c0, %c0_0] : memref<8x8x128xf32, #tpu.memory_space<vmem>>, vector<8x8x128xf32>
    %5 = arith.index_cast %2 : i32 to index
    %c0_1 = arith.constant 0 : index
    %c0_2 = arith.constant 0 : index
    %6 = vector.load %arg2[%5, %c0_1, %c0_2] : memref<8x8x128xf32, #tpu.memory_space<vmem>>, vector<8x8x128xf32>
    %7 = math.absf %4 : vector<8x8x128xf32>
    %cst_3 = arith.constant 0.000000e+00 : f32
    %8 = vector.broadcast %cst_3 : f32 to vector<8x8x128xf32>
    %9 = arith.subf %8, %7 : vector<8x8x128xf32>
    %10 = math.exp %9 : vector<8x8x128xf32>
    %cst_4 = arith.constant 0.000000e+00 : f32
    %11 = vector.broadcast %cst_4 : f32 to vector<8x8x128xf32>
    %12 = arith.minimumf %4, %11 : vector<8x8x128xf32>
    %cst_5 = arith.constant 1.000000e+00 : f32
    %13 = vector.broadcast %cst_5 : f32 to vector<8x8x128xf32>
    %14 = arith.addf %13, %10 : vector<8x8x128xf32>
    %15 = math.log %14 : vector<8x8x128xf32>
    %16 = arith.subf %12, %15 : vector<8x8x128xf32>
    %17 = arith.subf %16, %4 : vector<8x8x128xf32>
    %cst_6 = arith.constant -18.420681 : f32
    %cst_7 = arith.constant -9.99999993E-9 : f32
    %18 = vector.broadcast %cst_6 : f32 to vector<8x8x128xf32>
    %19 = arith.maximumf %18, %16 : vector<8x8x128xf32>
    %20 = vector.broadcast %cst_7 : f32 to vector<8x8x128xf32>
    %21 = arith.minimumf %20, %19 : vector<8x8x128xf32>
    %cst_8 = arith.constant -18.420681 : f32
    %cst_9 = arith.constant -9.99999993E-9 : f32
    %22 = vector.broadcast %cst_8 : f32 to vector<8x8x128xf32>
    %23 = arith.maximumf %22, %17 : vector<8x8x128xf32>
    %24 = vector.broadcast %cst_9 : f32 to vector<8x8x128xf32>
    %25 = arith.minimumf %24, %23 : vector<8x8x128xf32>
    %26 = arith.subf %21, %25 : vector<8x8x128xf32>
    %27 = arith.mulf %6, %26 : vector<8x8x128xf32>
    %28 = arith.addf %25, %27 : vector<8x8x128xf32>
    %cst_10 = arith.constant 0.000000e+00 : f32
    %29 = vector.broadcast %cst_10 : f32 to vector<8x8x128xf32>
    %30 = arith.subf %29, %28 : vector<8x8x128xf32>
    %cst_11 = arith.constant 1.000000e+00 : f32
    %31 = vector.broadcast %cst_11 : f32 to vector<8x8x128xf32>
    %32 = arith.addf %31, %10 : vector<8x8x128xf32>
    %33 = tpu.reciprocal %32 {approx = true} : vector<8x8x128xf32> -> vector<8x8x128xf32>
    %34 = arith.mulf %32, %33 : vector<8x8x128xf32>
    %cst_12 = arith.constant 2.000000e+00 : f32
    %35 = vector.broadcast %cst_12 : f32 to vector<8x8x128xf32>
    %36 = arith.subf %35, %34 : vector<8x8x128xf32>
    %37 = arith.mulf %33, %36 : vector<8x8x128xf32>
    %cst_13 = arith.constant 0.000000e+00 : f32
    %38 = vector.broadcast %cst_13 : f32 to vector<8x8x128xf32>
    %39 = arith.cmpf oge, %4, %38 : vector<8x8x128xf32>
    %cst_14 = arith.constant 1.000000e+00 : f32
    %40 = vector.broadcast %cst_14 : f32 to vector<8x8x128xf32>
    %41 = arith.select %39, %40, %10 : vector<8x8x128xi1>, vector<8x8x128xf32>
    %42 = arith.mulf %41, %37 : vector<8x8x128xf32>
    %43 = arith.addf %42, %6 : vector<8x8x128xf32>
    %44 = arith.mulf %6, %42 : vector<8x8x128xf32>
    %cst_15 = arith.constant 2.000000e+00 : f32
    %45 = vector.broadcast %cst_15 : f32 to vector<8x8x128xf32>
    %46 = arith.mulf %45, %44 : vector<8x8x128xf32>
    %47 = arith.subf %43, %46 : vector<8x8x128xf32>
    %48 = arith.mulf %47, %47 : vector<8x8x128xf32>
    %49 = arith.mulf %48, %30 : vector<8x8x128xf32>
    %cst_16 = arith.constant dense<0.000000e+00> : vector<8x128xf32>
    %50 = vector.multi_reduction <add>, %49, %cst_16 [0] : vector<8x8x128xf32> to vector<8x128xf32>
    %51 = arith.addf %0, %50 : vector<8x128xf32>
    %c1_i32 = arith.constant 1 : i32
    %c0_17 = arith.constant 0 : index
    %c0_18 = arith.constant 0 : index
    %c0_19 = arith.constant 0 : index
    %52 = vector.load %arg3[%c0_17, %c0_18, %c0_19] : memref<1x8x128xf32, #tpu.memory_space<vmem>>, vector<1x8x128xf32>
    %53 = vector.shape_cast %52 : vector<1x8x128xf32> to vector<8x128xf32>
    %54 = vector.shape_cast %51 : vector<8x128xf32> to vector<1x8x128xf32>
    tpu.vector_store %arg3[%c0_17, %c0_18, %c0_19], %54 {strides = array<i32>} : memref<1x8x128xf32, #tpu.memory_space<vmem>>, vector<1x8x128xf32>,
    return
  }
  func.func @transform_0(%arg0: i32) -> (i32, i32, i32) {
    %c0_i32 = arith.constant 0 : i32
    %c0_i32_0 = arith.constant 0 : i32
    %c0_i32_1 = arith.constant 0 : i32
    return %arg0, %c0_i32, %c0_i32_0 : i32, i32, i32
  }
  func.func @transform_1(%arg0: i32) -> (i32, i32, i32) {
    %c0_i32 = arith.constant 0 : i32
    %c0_i32_0 = arith.constant 0 : i32
    %c0_i32_1 = arith.constant 0 : i32
    return %arg0, %c0_i32, %c0_i32_0 : i32, i32, i32
  }
  func.func @transform_2(%arg0: i32) -> (i32, i32, i32) {
    %c0_i32 = arith.constant 0 : i32
    %c0_i32_0 = arith.constant 0 : i32
    %c0_i32_1 = arith.constant 0 : i32
    return %arg0, %c0_i32, %c0_i32_0 : i32, i32, i32
  }
}

</mosaic_0001>

<bundles_post_ra>
// kernel: tpu_custom_call.1
= control target key start
LH: loop header
LB: loop body
LE: loop exit
PB: predicated region body
PF: predicated region fallthrough
CT: control target
= control target key end

     0   :  { %7 = vsyncpa [#allocation3], 0  ;;  %s744_s0 = inlined_call_operand.hbm [shape: f32[8,8,128], index: 0, kind: input, shape index: {}]   ;;  %s745_s1 = inlined_call_operand.hbm [shape: f32[8,8,128], index: 1, kind: input, shape index: {}]   ;;  %s746_s2 = inlined_call_operand.hbm [shape: f32[1,8,128], index: 2, kind: output, shape index: {}]  }
   0x1   :  { %8 = vsyncpa [#allocation6], 0 }
   0x2   :  { %9 = vsyncpa [#allocation4], 0  ;;  %s457_s9 = smov [#allocation2]   ;;  %s385_s13 = scalar_lea.hbm %s744_s0, 1024 }
   0x3   :  { %s15_s10 = sshll.u32 %s457_s9, 4  ;;  %p386_p0 = scmp.ne.s32.totalorder %s744_s0, %s385_s13  ;;  %s16_s10 = int_to_ptr.vmem [resolvable:$true] %s15_s10 }
   0x4   :  { %p389_p1 = scmp.lt.u32.totalorder %s385_s13, %s744_s0 }
   0x6   :  { %p391_p2 = pnand %p389_p1, %p386_p0 }
   0x8   :  { %394 = shalt.err (!%p391_p2)
}
   0x9   :  { %s395_s18 = scalar_lea.vmem %s16_s10, 1024  ;;  %p400_p4 = scmp.lt.s32.totalorder %s16_s10, %s16_s10 }
   0xa   :  { %p396_p3 = scmp.ne.s32.totalorder %s16_s10, %s395_s18  ;;  %p401_p5 = scmp.lt.s32.totalorder %s395_s18, %s395_s18 }
   0xc   :  { %p402_p6 = por %p401_p5, %p400_p4 }
   0xe   :  { %p403_p7 = pnand %p402_p6, %p396_p3 }
  0x10   :  { %406 = shalt.err (!%p403_p7)
}
  0x11   :  { %s458_s19 = smov 128   ;;  %s459_s20 = smov 8  }
  0x12   :  { %21 = dma.hbm_to_vmem [thread:$0]  %s744_s0, 1024, %s16_s10, [#allocation3], %s458_s19, %s458_s19, %s459_s20  }
  0x13   :  { %s460_s23 = smov [#allocation5]   ;;  %s407_s27 = scalar_lea.hbm %s745_s1, 1024 }
  0x14   :  { %s27_s24 = sshll.u32 %s460_s23, 4  ;;  %p408_p8 = scmp.ne.s32.totalorder %s745_s1, %s407_s27  ;;  %s28_s24 = int_to_ptr.vmem [resolvable:$true] %s27_s24 }
  0x15   :  { %p411_p9 = scmp.lt.u32.totalorder %s407_s27, %s745_s1 }
  0x17   :  { %p413_p10 = pnand %p411_p9, %p408_p8 }
  0x19   :  { %416 = shalt.err (!%p413_p10)
}
  0x1a   :  { %s417_s4 = scalar_lea.vmem %s28_s24, 1024  ;;  %p422_p12 = scmp.lt.s32.totalorder %s28_s24, %s28_s24 }
  0x1b   :  { %p418_p11 = scmp.ne.s32.totalorder %s28_s24, %s417_s4  ;;  %p423_p13 = scmp.lt.s32.totalorder %s417_s4, %s417_s4 }
  0x1d   :  { %p424_p0 = por %p423_p13, %p422_p12 }
  0x1f   :  { %p425_p1 = pnand %p424_p0, %p418_p11 }
  0x21   :  { %428 = shalt.err (!%p425_p1)
}
  0x22   :  { %33 = dma.hbm_to_vmem [thread:$0]  %s745_s1, 1024, %s28_s24, [#allocation6], %s458_s19, %s458_s19, %s459_s20  }
  0x23   :  { %451 = dma.done.wait [#allocation3], 1024  }
  0x24   :  { %452 = vsyncadd [#allocation3], 4294966272 }
  0x25   :  { %453 = dma.done.wait [#allocation6], 1024  }
  0x26   :  { %454 = vsyncadd [#allocation6], 4294966272  ;;  %v501_v0 = vld [vmem:[#allocation2] sm:$0xff]  ;;  %v503_v1 = vld [vmem:[#allocation2 + $0x8] sm:$0xff]  ;;  %s461_s1 = smov [#allocation7]  }
  0x27   :  { %v505_v2 = vld [vmem:[#allocation2 + $0x10] sm:$0xff]  ;;  %v507_v3 = vld [vmem:[#allocation2 + $0x18] sm:$0xff]  ;;  %v59_v4 = vand.u32 2147483647, %v501_v0  ;;  %v510_v5 = vld [vmem:[#allocation2 + $0x20] sm:$0xff]  ;;  %v91_v48 = vmin.f32 %v501_v0, 0.0 }
  0x28   :  { %v512_v6 = vld [vmem:[#allocation2 + $0x28] sm:$0xff]  ;;  %v60_v7 = vand.u32 2147483647, %v503_v1  ;;  %v515_v8 = vld [vmem:[#allocation2 + $0x30] sm:$0xff]  ;;  %v517_v9 = vld [vmem:[#allocation2 + $0x38] sm:$0xff]  ;;  %v92_v49 = vmin.f32 %v503_v1, 0.0 }
  0x29   :  { %v61_v10 = vand.u32 2147483647, %v505_v2  ;;  %v67_v11 = vsub.f32 0.0, %v59_v4  ;;  %v62_v12 = vand.u32 2147483647, %v507_v3  ;;  %v93_v50 = vmin.f32 %v505_v2, 0.0 }
  0x2a   :  { %v68_v13 = vsub.f32 0.0, %v60_v7  ;;  %v63_v14 = vand.u32 2147483647, %v510_v5  ;;  %v64_v15 = vand.u32 2147483647, %v512_v6  ;;  %v94_v51 = vmin.f32 %v507_v3, 0.0 }
  0x2b   :  { %v69_v16 = vsub.f32 0.0, %v61_v10  ;;  %v65_v17 = vand.u32 2147483647, %v515_v8  ;;  %v66_v18 = vand.u32 2147483647, %v517_v9  ;;  %v70_v19 = vsub.f32 0.0, %v62_v12 }
  0x2c   :  { %v71_v20 = vsub.f32 0.0, %v63_v14  ;;  %v72_v21 = vsub.f32 0.0, %v64_v15  ;;  %v75_v22 = vmul.f32 1.442695, %v67_v11  ;;  %v77_v23 = vmul.f32 1.442695, %v68_v13 }
  0x2d   :  { %v73_v24 = vsub.f32 0.0, %v65_v17  ;;  %v74_v25 = vsub.f32 0.0, %v66_v18  ;;  %v79_v26 = vmul.f32 1.442695, %v69_v16  ;;  %v81_v27 = vmul.f32 1.442695, %v70_v19 }
  0x2e   :  { %337 = vpow2.f32 %v75_v22  ;;  %v83_v28 = vmul.f32 1.442695, %v71_v20  ;;  %v85_v29 = vmul.f32 1.442695, %v72_v21  ;;  %vm235_vm0 = vcmp.ge.f32.partialorder %v501_v0, 0.0  ;;  %s322_s6 = sshll.u32 %s461_s1, 4  ;;  %s323_s6 = int_to_ptr.vmem [resolvable:$true] %s322_s6 }
  0x2f   :  { %339 = vpow2.f32 %v77_v23  ;;  %v87_v30 = vmul.f32 1.442695, %v73_v24  ;;  %v89_v31 = vmul.f32 1.442695, %v74_v25  ;;  %v95_v53 = vmin.f32 %v510_v5, 0.0  ;;  %s429_s7 = scalar_lea.vmem %s323_s6, 128  ;;  %p434_p3 = scmp.lt.s32.totalorder %s323_s6, %s323_s6 }
  0x30   :  { %341 = vpow2.f32 %v79_v26  ;;  %v96_v54 = vmin.f32 %v512_v6, 0.0  ;;  %vm236_vm1 = vcmp.ge.f32.partialorder %v503_v1, 0.0  ;;  %v97_v56 = vmin.f32 %v515_v8, 0.0  ;;  %p430_p2 = scmp.ne.s32.totalorder %s323_s6, %s429_s7  ;;  %p435_p4 = scmp.lt.s32.totalorder %s429_s7, %s429_s7 }
  0x31   :  { %343 = vpow2.f32 %v81_v27  ;;  %vm237_vm2 = vcmp.ge.f32.partialorder %v505_v2, 0.0  ;;  %v98_v59 = vmin.f32 %v517_v9, 0.0  ;;  %vm238_vm3 = vcmp.ge.f32.partialorder %v507_v3, 0.0 }
  0x32   :  { %345 = vpow2.f32 %v83_v28  ;;  %vm239_vm4 = vcmp.ge.f32.partialorder %v510_v5, 0.0  ;;  %vm240_vm5 = vcmp.ge.f32.partialorder %v512_v6, 0.0  ;;  %vm241_vm6 = vcmp.ge.f32.partialorder %v515_v8, 0.0  ;;  %p436_p5 = por %p435_p4, %p434_p3 }
  0x33   :  { %347 = vpow2.f32 %v85_v29  ;;  %vm242_vm7 = vcmp.ge.f32.partialorder %v517_v9, 0.0 }
  0x34   :  { %349 = vpow2.f32 %v87_v30  ;;  %p437_p6 = pnand %p436_p5, %p430_p2 }
  0x35   :  { %351 = vpow2.f32 %v89_v31 }
  0x38   :  { %v338_v32 = vpop.eup %337 }
  0x39   :  { %v340_v33 = vpop.eup %339  ;;  %v525_v34 = vadd.f32 1.0, %v338_v32  ;;  %v579_v61 = vsel %vm235_vm0, 1.0, %v338_v32 }
  0x3a   :  { %v342_v35 = vpop.eup %341  ;;  %v527_v36 = vadd.f32 1.0, %v340_v33  ;;  %v582_v7 = vsel %vm236_vm1, 1.0, %v340_v33 }
  0x3b   :  { %v529_v37 = vpop.eup %343  ;;  %v531_v38 = vadd.f32 1.0, %v342_v35  ;;  %353 = vlog2.f32 %v525_v34  ;;  %v585_v13 = vsel %vm237_vm2, 1.0, %v342_v35 }
  0x3c   :  { %v534_v39 = vpop.eup %345  ;;  %v537_v40 = vadd.f32 1.0, %v529_v37  ;;  %355 = vlog2.f32 %v527_v36 }
  0x3d   :  { %v540_v41 = vpop.eup %347  ;;  %v543_v42 = vadd.f32 1.0, %v534_v39  ;;  %357 = vlog2.f32 %v531_v38 }
  0x3e   :  { %v546_v43 = vpop.eup %349  ;;  %v549_v44 = vadd.f32 1.0, %v540_v41  ;;  %359 = vlog2.f32 %v537_v40 }
  0x3f   :  { %v552_v45 = vpop.eup %351  ;;  %v555_v46 = vadd.f32 1.0, %v546_v43  ;;  %361 = vlog2.f32 %v543_v42 }
  0x40   :  { %v559_v47 = vadd.f32 1.0, %v552_v45  ;;  %363 = vlog2.f32 %v549_v44 }
  0x41   :  { %365 = vlog2.f32 %v555_v46 }
  0x42   :  { %367 = vlog2.f32 %v559_v47 }
  0x43   :  { %369 = vrcp.f32 %v525_v34 }
  0x44   :  { %371 = vrcp.f32 %v527_v36 }
  0x45   :  { %v354_v52 = vpop.eup %353  ;;  %373 = vrcp.f32 %v531_v38 }
  0x46   :  { %v356_v55 = vpop.eup %355  ;;  %v108_v57 = vmul.f32 0.6931472, %v354_v52  ;;  %375 = vrcp.f32 %v537_v40 }
  0x47   :  { %v358_v58 = vpop.eup %357  ;;  %v110_v60 = vmul.f32 0.6931472, %v356_v55  ;;  %377 = vrcp.f32 %v543_v42 }
  0x48   :  { %v360_v62 = vpop.eup %359  ;;  %v112_v63 = vmul.f32 0.6931472, %v358_v58  ;;  %v123_v4 = vsub.f32 %v91_v48, %v108_v57  ;;  %379 = vrcp.f32 %v549_v44 }
  0x49   :  { %v362_v10 = vpop.eup %361  ;;  %v114_v11 = vmul.f32 0.6931472, %v360_v62  ;;  %v124_v12 = vsub.f32 %v92_v49, %v110_v60  ;;  %381 = vrcp.f32 %v555_v46 }
  0x4a   :  { %v364_v14 = vpop.eup %363  ;;  %v116_v15 = vmul.f32 0.6931472, %v362_v10  ;;  %v125_v16 = vsub.f32 %v93_v50, %v112_v63  ;;  %v131_v17 = vsub.f32 %v123_v4, %v501_v0  ;;  %v139_v18 = vmax.f32 %v123_v4, -18.420681 }
  0x4b   :  { %v366_v19 = vpop.eup %365  ;;  %v118_v20 = vmul.f32 0.6931472, %v364_v14  ;;  %v126_v21 = vsub.f32 %v94_v51, %v114_v11  ;;  %v132_v22 = vsub.f32 %v124_v12, %v503_v1  ;;  %v140_v23 = vmax.f32 %v124_v12, -18.420681 }
  0x4c   :  { %v368_v24 = vpop.eup %367  ;;  %v120_v25 = vmul.f32 0.6931472, %v366_v19  ;;  %v127_v26 = vsub.f32 %v95_v53, %v116_v15  ;;  %v133_v27 = vsub.f32 %v125_v16, %v505_v2  ;;  %v141_v28 = vmax.f32 %v125_v16, -18.420681 }
  0x4d   :  { %v122_v29 = vmul.f32 0.6931472, %v368_v24  ;;  %v128_v30 = vsub.f32 %v96_v54, %v118_v20  ;;  %v134_v31 = vsub.f32 %v126_v21, %v507_v3  ;;  %v142_v32 = vmax.f32 %v126_v21, -18.420681  ;;  %v591_v33 = vpop.eup %369 }
  0x4e   :  { %v129_v0 = vsub.f32 %v97_v56, %v120_v25  ;;  %v135_v35 = vsub.f32 %v127_v26, %v510_v5  ;;  %v143_v48 = vmax.f32 %v127_v26, -18.420681  ;;  %v147_v49 = vmin.f32 %v139_v18, -1e-08  ;;  %v595_v1 = vpop.eup %371 }
  0x4f   :  { %v130_v50 = vsub.f32 %v98_v59, %v122_v29  ;;  %v136_v2 = vsub.f32 %v128_v30, %v512_v6  ;;  %v144_v51 = vmax.f32 %v128_v30, -18.420681  ;;  %v148_v52 = vmin.f32 %v140_v23, -1e-08  ;;  %v598_v53 = vpop.eup %373 }
  0x50   :  { %v137_v54 = vsub.f32 %v129_v0, %v515_v8  ;;  %v145_v55 = vmax.f32 %v129_v0, -18.420681  ;;  %v149_v57 = vmin.f32 %v141_v28, -1e-08  ;;  %v150_v56 = vmin.f32 %v142_v32, -1e-08  ;;  %v602_v58 = vpop.eup %375 }
  0x51   :  { %v138_v60 = vsub.f32 %v130_v50, %v517_v9  ;;  %v146_v62 = vmax.f32 %v130_v50, -18.420681  ;;  %v151_v63 = vmin.f32 %v143_v48, -1e-08  ;;  %v152_v59 = vmin.f32 %v144_v51, -1e-08  ;;  %v608_v4 = vpop.eup %377 }
  0x52   :  { %v153_v10 = vmin.f32 %v145_v55, -1e-08  ;;  %v155_v11 = vmax.f32 %v131_v17, -18.420681  ;;  %v156_v12 = vmax.f32 %v132_v22, -18.420681  ;;  %v611_v14 = vpop.eup %379  ;;  %383 = vrcp.f32 %v559_v47 }
  0x53   :  { %v154_v15 = vmin.f32 %v146_v62, -1e-08  ;;  %v157_v16 = vmax.f32 %v133_v27, -18.420681  ;;  %v158_v18 = vmax.f32 %v134_v31, -18.420681  ;;  %v213_v6 = vmul.f32 %v598_v53, %v531_v38 }
  0x54   :  { %v159_v19 = vmax.f32 %v135_v35, -18.420681  ;;  %v160_v20 = vmax.f32 %v136_v2, -18.420681  ;;  %v614_v21 = vmax.f32 %v137_v54, -18.420681  ;;  %v214_v8 = vmul.f32 %v602_v58, %v537_v40 }
  0x55   :  { %v616_v23 = vmax.f32 %v138_v60, -18.420681  ;;  %v163_v24 = vmin.f32 %v155_v11, -1e-08  ;;  %v164_v25 = vmin.f32 %v156_v12, -1e-08  ;;  %v215_v38 = vmul.f32 %v608_v4, %v543_v42 }
  0x56   :  { %v165_v26 = vmin.f32 %v157_v16, -1e-08  ;;  %v166_v17 = vmin.f32 %v158_v18, -1e-08  ;;  %v167_v22 = vmin.f32 %v159_v19, -1e-08  ;;  %v216_v40 = vmul.f32 %v611_v14, %v549_v44 }
  0x57   :  { %v168_v28 = vmin.f32 %v160_v20, -1e-08  ;;  %v169_v29 = vmin.f32 %v614_v21, -1e-08  ;;  %v170_v30 = vmin.f32 %v616_v23, -1e-08  ;;  %v171_v27 = vsub.f32 %v147_v49, %v163_v24 }
  0x58   :  { %v620_v31 = vld [vmem:[#allocation5] sm:$0xff]  ;;  %v172_v32 = vsub.f32 %v148_v52, %v164_v25  ;;  %v173_v0 = vsub.f32 %v149_v57, %v165_v26  ;;  %v174_v35 = vsub.f32 %v150_v56, %v166_v17  ;;  %v175_v48 = vsub.f32 %v151_v63, %v167_v22  ;;  %v622_v50 = vld [vmem:[#allocation5 + $0x8] sm:$0xff]  ;;  %v624_v2 = vld [vmem:[#allocation5 + $0x10] sm:$0xff] }
  0x59   :  { %v626_v51 = vld [vmem:[#allocation5 + $0x18] sm:$0xff]  ;;  %v176_v54 = vsub.f32 %v152_v59, %v168_v28  ;;  %v177_v55 = vsub.f32 %v153_v10, %v169_v29  ;;  %v179_v60 = vmul.f32 %v171_v27, %v620_v31  ;;  %v246_v49 = vsel %vm238_vm3, 1.0, %v529_v37  ;;  %v634_v52 = vld [vmem:[#allocation5 + $0x20] sm:$0xff]  ;;  %v636_v57 = vld [vmem:[#allocation5 + $0x28] sm:$0xff]  ;;  %v382_v37 = vpop.eup %381 }
  0x5a   :  { %v178_v56 = vsub.f32 %v154_v15, %v170_v30  ;;  %v180_v62 = vmul.f32 %v172_v32, %v622_v50  ;;  %v181_v63 = vmul.f32 %v173_v0, %v624_v2  ;;  %v182_v59 = vmul.f32 %v174_v35, %v626_v51  ;;  %v650_v16 = vld [vmem:[#allocation5 + $0x30] sm:$0xff] }
  0x5b   :  { %v183_v10 = vmul.f32 %v175_v48, %v634_v52  ;;  %v184_v11 = vmul.f32 %v176_v54, %v636_v57  ;;  %v645_v12 = vadd.f32 %v179_v60, %v163_v24  ;;  %v247_v3 = vsel %vm239_vm4, 1.0, %v534_v39  ;;  %v663_v39 = vld [vmem:[#allocation5 + $0x38] sm:$0xff] }
  0x5c   :  { %v211_v15 = vmul.f32 %v591_v33, %v525_v34  ;;  %v248_v18 = vsel %vm240_vm5, 1.0, %v540_v41  ;;  %v249_v19 = vsel %vm241_vm6, 1.0, %v546_v43  ;;  %v250_v20 = vsel %vm242_vm7, 1.0, %v552_v45  ;;  %v384_v5 = vpop.eup %383 }
  0x5d   :  { %v666_v24 = vmul.f32 %v177_v55, %v650_v16  ;;  %v212_v34 = vmul.f32 %v595_v1, %v527_v36  ;;  %v675_v41 = vmul.f32 %v178_v56, %v663_v39  ;;  %v677_v9 = vadd.f32 %v180_v62, %v164_v25 }
  0x5e   :  { %v679_v43 = vadd.f32 %v181_v63, %v165_v26  ;;  %v681_v45 = vadd.f32 %v182_v59, %v166_v17  ;;  %v683_v27 = vadd.f32 %v183_v10, %v167_v22  ;;  %v685_v32 = vadd.f32 %v184_v11, %v168_v28 }
  0x5f   :  { %v195_v36 = vsub.f32 0.0, %v645_v12  ;;  %v217_v0 = vmul.f32 %v382_v37, %v555_v46  ;;  %v218_v25 = vmul.f32 %v384_v5, %v559_v47  ;;  %v219_v26 = vsub.f32 2.0, %v211_v15 }
  0x60   :  { %v220_v35 = vsub.f32 2.0, %v212_v34  ;;  %v221_v17 = vsub.f32 2.0, %v213_v6  ;;  %v222_v48 = vsub.f32 2.0, %v214_v8  ;;  %v223_v22 = vsub.f32 2.0, %v215_v38 }
  0x61   :  { %v224_v54 = vsub.f32 2.0, %v216_v40  ;;  %v225_v28 = vsub.f32 2.0, %v217_v0  ;;  %v226_v55 = vsub.f32 2.0, %v218_v25  ;;  %v227_v60 = vmul.f32 %v591_v33, %v219_v26 }
  0x62   :  { %v228_v56 = vmul.f32 %v595_v1, %v220_v35  ;;  %v229_v42 = vmul.f32 %v598_v53, %v221_v17  ;;  %v230_v44 = vmul.f32 %v602_v58, %v222_v48  ;;  %v231_v46 = vmul.f32 %v608_v4, %v223_v22 }
  0x63   :  { %v232_v47 = vmul.f32 %v611_v14, %v224_v54  ;;  %v233_v62 = vmul.f32 %v382_v37, %v225_v28  ;;  %v234_v63 = vmul.f32 %v384_v5, %v226_v55  ;;  %v251_v59 = vmul.f32 %v579_v61, %v227_v60 }
  0x64   :  { %v252_v10 = vmul.f32 %v582_v7, %v228_v56  ;;  %v253_v11 = vmul.f32 %v585_v13, %v229_v42  ;;  %v254_v15 = vmul.f32 %v246_v49, %v230_v44  ;;  %v255_v33 = vmul.f32 %v247_v3, %v231_v46 }
  0x65   :  { %v196_v1 = vsub.f32 0.0, %v677_v9  ;;  %v256_v34 = vmul.f32 %v248_v18, %v232_v47  ;;  %v257_v53 = vmul.f32 %v249_v19, %v233_v62  ;;  %v258_v6 = vmul.f32 %v250_v20, %v234_v63 }
  0x66   :  { %v197_v58 = vsub.f32 0.0, %v679_v43  ;;  %v259_v4 = vadd.f32 %v251_v59, %v620_v31  ;;  %v260_v14 = vadd.f32 %v252_v10, %v622_v50  ;;  %v261_v37 = vadd.f32 %v253_v11, %v624_v2 }
  0x67   :  { %v262_v61 = vadd.f32 %v254_v15, %v626_v51  ;;  %v263_v7 = vadd.f32 %v255_v33, %v634_v52  ;;  %v264_v13 = vadd.f32 %v256_v34, %v636_v57  ;;  %v267_v49 = vmul.f32 %v251_v59, %v620_v31 }
  0x68   :  { %v268_v3 = vmul.f32 %v252_v10, %v622_v50  ;;  %v269_v18 = vmul.f32 %v253_v11, %v624_v2  ;;  %v270_v19 = vmul.f32 %v254_v15, %v626_v51  ;;  %v271_v20 = vmul.f32 %v255_v33, %v634_v52 }
  0x69   :  { %v272_v5 = vmul.f32 %v256_v34, %v636_v57  ;;  %v273_v8 = vmul.f32 %v257_v53, %v650_v16  ;;  %v274_v9 = vmul.f32 %v258_v6, %v663_v39  ;;  %v275_v43 = vmul.f32 2.0, %v267_v49 }
  0x6a   :  { %v276_v38 = vmul.f32 2.0, %v268_v3  ;;  %v277_v40 = vmul.f32 2.0, %v269_v18  ;;  %v278_v0 = vmul.f32 2.0, %v270_v19  ;;  %v279_v25 = vmul.f32 2.0, %v271_v20 }
  0x6b   :  { %v265_v31 = vadd.f32 %v257_v53, %v650_v16  ;;  %v280_v50 = vmul.f32 2.0, %v272_v5  ;;  %v281_v26 = vmul.f32 2.0, %v273_v8  ;;  %v283_v2 = vsub.f32 %v259_v4, %v275_v43 }
  0x6c   :  { %v284_v35 = vsub.f32 %v260_v14, %v276_v38  ;;  %v285_v51 = vsub.f32 %v261_v37, %v277_v40  ;;  %v286_v17 = vsub.f32 %v262_v61, %v278_v0  ;;  %v287_v52 = vsub.f32 %v263_v7, %v279_v25 }
  0x6d   :  { %v198_v57 = vsub.f32 0.0, %v681_v45  ;;  %v266_v48 = vadd.f32 %v258_v6, %v663_v39  ;;  %v282_v22 = vmul.f32 2.0, %v274_v9  ;;  %v291_v54 = vmul.f32 %v283_v2, %v283_v2 }
  0x6e   :  { %v288_v28 = vsub.f32 %v264_v13, %v280_v50  ;;  %v292_v55 = vmul.f32 %v284_v35, %v284_v35  ;;  %v293_v60 = vmul.f32 %v285_v51, %v285_v51  ;;  %v294_v56 = vmul.f32 %v286_v17, %v286_v17 }
  0x6f   :  { %v193_v16 = vadd.f32 %v666_v24, %v169_v29  ;;  %v199_v42 = vsub.f32 0.0, %v683_v27  ;;  %v299_v44 = vmul.f32 %v291_v54, %v195_v36  ;;  %v289_v46 = vsub.f32 %v265_v31, %v281_v26 }
  0x70   :  { %v295_v47 = vmul.f32 %v287_v52, %v287_v52  ;;  %v300_v45 = vmul.f32 %v292_v55, %v196_v1  ;;  %v301_v62 = vmul.f32 %v293_v60, %v197_v58  ;;  %v194_v39 = vadd.f32 %v675_v41, %v170_v30 }
  0x71   :  { %v200_v63 = vsub.f32 0.0, %v685_v32  ;;  %v290_v59 = vsub.f32 %v266_v48, %v282_v22  ;;  %v296_v10 = vmul.f32 %v288_v28, %v288_v28  ;;  %v302_v21 = vmul.f32 %v294_v56, %v198_v57 }
  0x72   :  { %v307_v11 = vadd.f32 %v300_v45, %v299_v44  ;;  %v201_v29 = vsub.f32 0.0, %v193_v16  ;;  %v297_v24 = vmul.f32 %v289_v46, %v289_v46  ;;  %v303_v27 = vmul.f32 %v295_v47, %v199_v42 }
  0x73   :  { %v202_v12 = vsub.f32 0.0, %v194_v39  ;;  %v298_v36 = vmul.f32 %v290_v59, %v290_v59  ;;  %v304_v33 = vmul.f32 %v296_v10, %v200_v63 }
  0x74   :  { %v308_v15 = vadd.f32 %v307_v11, %v301_v62  ;;  %v305_v1 = vmul.f32 %v297_v24, %v201_v29 }
  0x75   :  { %v306_v6 = vmul.f32 %v298_v36, %v202_v12 }
  0x76   :  { %v309_v34 = vadd.f32 %v308_v15, %v302_v21 }
  0x78   :  { %v310_v53 = vadd.f32 %v309_v34, %v303_v27 }
  0x7a   :  { %v311_v23 = vadd.f32 %v310_v53, %v304_v33 }
  0x7c   :  { %v312_v30 = vadd.f32 %v311_v23, %v305_v1 }
  0x7e   :  { %v313_v41 = vadd.f32 %v312_v30, %v306_v6 }
  0x80   :  { %315 = vst [vmem:[#allocation7] sm:$0xff] %v313_v41 }
  0x81   :  { %440 = shalt.err (!%p437_p6)
}
  0x82   :  { %s441_s10 = scalar_lea.hbm %s746_s2, 128 }
  0x83   :  { %p442_p7 = scmp.ne.s32.totalorder %s746_s2, %s441_s10  ;;  %p445_p8 = scmp.lt.u32.totalorder %s441_s10, %s746_s2 }
  0x85   :  { %p447_p9 = pnand %p445_p8, %p442_p7 }
  0x87   :  { %450 = shalt.err (!%p447_p9)
}
  0x88   :  { %325 = dma.vmem_to_hbm [thread:$0]  %s323_s6, 128, %s746_s2, [#allocation4]  }
  0x89   :  { %455 = dma.done.wait [#allocation4], 128  }
  0x8a   :  { %456 = vsyncadd [#allocation4], 4294967168 }
  0x8b   :  { %329 = vsyncpa [#allocation3], 1 }
  0x8c   :  { %330 = vsyncpa [#allocation6], 1 }
  0x8d   :  { %331 = vsyncpa [#allocation4], 1 }

</bundles_post_ra>
